<compile_context>
chip_gen: v7x
topology: tpu7x:2x2x1
jax: 0.10.0
libtpu: 0.0.40
codegen_flags: <defaults>
</compile_context>

<pallas_src>
import functools

import jax
import jax.numpy as jnp
from jax.experimental import pallas as pl
from jax.experimental.pallas import tpu as pltpu


def _round_up(v, m):
    return -(-v // m) * m


# --------------------------------------------------------------------------- #
# Prepass 1: per-output-channel weight integer codes  qw = round(W * (1/S_w))  #
# --------------------------------------------------------------------------- #
def _weight_code_kernel(w_ref, isw_ref, q_ref):
    w = w_ref[...].astype(jnp.float32)
    q_ref[...] = jnp.round(w * isw_ref[...]).astype(q_ref.dtype)


def _weight_codes(wp, iswp, *, tn, tk, out_dtype):
    op, kp = wp.shape
    return pl.pallas_call(
        _weight_code_kernel,
        out_shape=jax.ShapeDtypeStruct((op, kp), out_dtype),
        grid=(op // tn, kp // tk),
        in_specs=[
            pl.BlockSpec((tn, tk), lambda n, k: (n, k)),   # raw weight tile
            pl.BlockSpec((tn, 1), lambda n, k: (n, 0)),    # 1/S_w per channel
        ],
        out_specs=pl.BlockSpec((tn, tk), lambda n, k: (n, k)),
        compiler_params=pltpu.CompilerParams(
            dimension_semantics=("parallel", "parallel"),
            vmem_limit_bytes=32 * 1024 * 1024,
        ),
    )(wp, iswp)


# --------------------------------------------------------------------------- #
# Prepass 2: activation integer codes  qx = floor(clamp(x, 0, clip) * a_scale) #
# --------------------------------------------------------------------------- #
def _act_code_kernel(params_ref, x_ref, q_ref):
    clip_val = params_ref[0]
    a_scale = params_ref[1]
    x = x_ref[...].astype(jnp.float32)
    q_ref[...] = jnp.floor(jnp.clip(x, 0.0, clip_val) * a_scale).astype(q_ref.dtype)


def _act_codes(xp, act_params, *, tm, tk, out_dtype):
    bp, kp = xp.shape
    return pl.pallas_call(
        _act_code_kernel,
        out_shape=jax.ShapeDtypeStruct((bp, kp), out_dtype),
        grid=(bp // tm, kp // tk),
        in_specs=[
            pl.BlockSpec(memory_space=pltpu.SMEM),          # [clip_val, a_scale]
            pl.BlockSpec((tm, tk), lambda i, k: (i, k)),
        ],
        out_specs=pl.BlockSpec((tm, tk), lambda i, k: (i, k)),
        compiler_params=pltpu.CompilerParams(
            dimension_semantics=("parallel", "parallel"),
            vmem_limit_bytes=32 * 1024 * 1024,
        ),
    )(act_params, xp)


# --------------------------------------------------------------------------- #
# Kernel 3: tiled integer-code GEMM + one-shot per-channel dequant at finalize #
# --------------------------------------------------------------------------- #
def _qgemm_kernel(*refs, has_bias):
    if has_bias:
        x_ref, w_ref, scale_ref, b_ref, o_ref, acc_ref = refs
    else:
        x_ref, w_ref, scale_ref, o_ref, acc_ref = refs

    k = pl.program_id(2)

    @pl.when(k == 0)
    def _init():
        acc_ref[...] = jnp.zeros_like(acc_ref)

    # Integer codes straight to the MXU; contract on the shared in_features axis:
    # (tm, tk) x (tn, tk) -> (tm, tn). No Wq.T is ever materialized.
    acc_ref[...] += jax.lax.dot_general(
        x_ref[...], w_ref[...],
        dimension_numbers=(((1,), (1,)), ((), ())),
        preferred_element_type=jnp.float32)

    @pl.when(k == pl.num_programs(2) - 1)
    def _finalize():
        # Single broadcast rescale: acc * (S_w / a_scale) per output channel.
        out = acc_ref[...] * scale_ref[...]
        if has_bias:
            out = out + b_ref[...]
        o_ref[...] = out.astype(o_ref.dtype)


# --------------------------------------------------------------------------- #
# Tile selection + weight preparation (cacheable across calls)                 #
# --------------------------------------------------------------------------- #
def _select_nk_tiles(o_dim, k_dim, tn, tk, lane_multiple):
    tn = min(tn, _round_up(o_dim, lane_multiple))
    tk = min(tk, _round_up(k_dim, lane_multiple))
    # v7x megacore: make sure the parallel grid has >=2 N blocks so both
    # TensorCores get work (one extra grid step at most on 1-TC v5e/v6e).
    if (_round_up(o_dim, tn) // tn) < 2 and tn > 128 and (tn // 2) % 128 == 0 \
            and _round_up(o_dim, tn // 2) // (tn // 2) >= 2:
        tn //= 2
    return tn, tk


def prepare_weight(weight, *, wbits=8, tn=512, tk=2048, lane_multiple=256,
                   mxu_dtype=jnp.bfloat16):
    """One-shot weight preprocessing: per-channel scales, zero-pad, code quant.

    For inference with static weights, call once and pass the result to
    quantized_linear(prepared_weight=...) so the min/max reductions, the padded
    copy of W and the quantization prepass don't re-read W from HBM every call.
    """
    f32 = jnp.float32
    weight = weight.astype(f32)
    o_dim, k_dim = weight.shape
    tn, tk = _select_nk_tiles(o_dim, k_dim, tn, tk, lane_multiple)
    op, kp = _round_up(o_dim, tn), _round_up(k_dim, tk)

    # per-output-channel asymmetric min/max scale: tiny (O,) reduction, done once.
    ch_max = jnp.max(weight, axis=1, keepdims=True)
    ch_min = jnp.min(weight, axis=1, keepdims=True)
    ch_range = ch_max - ch_min
    ch_range = jnp.where(ch_range == 0.0, 1.0, ch_range)
    s_w = (ch_range / float(2 ** wbits - 1)).astype(f32)       # (O, 1)
    inv_s_w = (1.0 / s_w).astype(f32)

    # Zero padding is exact: padded rows/cols quantize to code 0.
    wp = jnp.zeros((op, kp), f32).at[:o_dim, :k_dim].set(weight)
    iswp = jnp.ones((op, 1), f32).at[:o_dim].set(inv_s_w)
    qw = _weight_codes(wp, iswp, tn=tn, tk=tk, out_dtype=mxu_dtype)
    s_w_row = jnp.ones((1, op), f32).at[0, :o_dim].set(s_w[:, 0])

    return dict(qw=qw, s_w_row=s_w_row, tn=tn, tk=tk,
                o_dim=o_dim, k_dim=k_dim, mxu_dtype=mxu_dtype)


# --------------------------------------------------------------------------- #
# Wrapper                                                                      #
# --------------------------------------------------------------------------- #
def quantized_linear(x, weight=None, bias=None, clip_val=6.0, *, abits=8, wbits=8,
                     tm=128, tn=512, tk=2048, lane_multiple=256,
                     mxu_dtype=jnp.bfloat16,
                     vmem_limit_bytes=48 * 1024 * 1024,
                     prepared_weight=None):
    """Forward pass of QuantizedLinear.

    x: (B, inplane), weight: (outplane, inplane) [torch.nn.Linear layout],
    bias: (outplane,) or None, clip_val: PACT clip (scalar).

    Defaults target v6e/v7x: bf16 integer-code MXU operands, tn/tk 256-aligned,
    vmem_limit_bytes=48 MiB (safe for v7x's 64 MiB/TC; v5e/v6e have headroom).
    Pass prepared_weight=prepare_weight(W, ...) to cache weight preprocessing.
    """
    f32 = jnp.float32
    x = x.astype(f32)
    b_dim, k_dim = x.shape

    if prepared_weight is None:
        prepared_weight = prepare_weight(weight, wbits=wbits, tn=tn, tk=tk,
                                         lane_multiple=lane_multiple,
                                         mxu_dtype=mxu_dtype)
    qw = prepared_weight["qw"]
    s_w_row = prepared_weight["s_w_row"]
    tn = prepared_weight["tn"]
    tk = prepared_weight["tk"]
    o_dim = prepared_weight["o_dim"]
    mxu_dtype = prepared_weight["mxu_dtype"]
    assert k_dim == prepared_weight["k_dim"]
    op, kp = qw.shape

    # ---- activation quant scalars ----
    n_a = float(2 ** abits - 1)
    clip_val = jnp.asarray(clip_val, f32)
    a_scale = n_a / clip_val
    inv_a_scale = 1.0 / a_scale
    act_params = jnp.stack([clip_val, a_scale]).astype(f32)

    # Combined per-output-channel dequant scale, applied once at finalize.
    out_scale = (s_w_row * inv_a_scale).astype(f32)            # (1, op)

    # ---- M tile + VMEM budget (halve tk if estimated usage exceeds ~80%) ----
    tm = min(tm, _round_up(b_dim, 8))
    mxu_bytes = jnp.dtype(mxu_dtype).itemsize

    def _gemm_vmem(tk_):
        return (2 * (tm * tk_ + tn * tk_) * mxu_bytes          # double-buffered operands
                + 3 * tm * tn * 4                              # out (x2 bufs) + f32 acc
                + 4 * tn * 4)                                   # scale/bias rows

    while (_gemm_vmem(tk) > int(0.8 * vmem_limit_bytes)
           and tk >= 256 and (tk // 2) % 128 == 0):
        tk //= 2

    bp = _round_up(b_dim, tm)

    # ---- activation codes (one-shot prepass; padded x quantizes to code 0) ----
    xp = jnp.zeros((bp, kp), f32).at[:b_dim, :k_dim].set(x)
    qx = _act_codes(xp, act_params, tm=tm, tk=tk, out_dtype=mxu_dtype)

    # ---- GEMM ----
    has_bias = bias is not None
    inputs = [qx, qw, out_scale]
    in_specs = [
        pl.BlockSpec((tm, tk), lambda i, j, k: (i, k)),        # activation codes
        pl.BlockSpec((tn, tk), lambda i, j, k: (j, k)),        # weight codes
        pl.BlockSpec((1, tn), lambda i, j, k: (0, j)),         # per-channel dequant scale
    ]
    if has_bias:
        bias_row = jnp.zeros((1, op), f32).at[0, :o_dim].set(bias.astype(f32))
        inputs.append(bias_row)
        in_specs.append(pl.BlockSpec((1, tn), lambda i, j, k: (0, j)))

    grid = (bp // tm, op // tn, kp // tk)
    cost = pl.CostEstimate(
        flops=2 * bp * op * kp,
        transcendentals=0,
        bytes_accessed=(bp * kp + op * kp) * mxu_bytes + bp * op * 4,
    )

    out = pl.pallas_call(
        functools.partial(_qgemm_kernel, has_bias=has_bias),
        out_shape=jax.ShapeDtypeStruct((bp, op), jnp.float32),
        grid=grid,
        in_specs=in_specs,
        out_specs=pl.BlockSpec((tm, tn), lambda i, j, k: (i, j)),
        scratch_shapes=[pltpu.VMEM((tm, tn), jnp.float32)],
        compiler_params=pltpu.CompilerParams(
            dimension_semantics=("parallel", "parallel", "arbitrary"),
            vmem_limit_bytes=vmem_limit_bytes,
        ),
        cost_estimate=cost,
    )(*inputs)

    return out[:b_dim, :o_dim]


# --------------------------------------------------------------------------- #
# Pure-JAX reference mirroring the PyTorch forward.                            #
# --------------------------------------------------------------------------- #
def _reference(x, weight, bias, clip_val, abits, wbits):
    n_a = float(2 ** abits - 1)
    clip_val = jnp.asarray(clip_val, jnp.float32)
    a_scale = n_a / clip_val
    xq = jnp.floor(jnp.clip(x, 0.0, clip_val) * a_scale) / a_scale

    ch_max = jnp.max(weight, axis=1, keepdims=True)
    ch_min = jnp.min(weight, axis=1, keepdims=True)
    ch_range = ch_max - ch_min
    ch_range = jnp.where(ch_range == 0.0, 1.0, ch_range)
    s_w = ch_range / float(2 ** wbits - 1)
    wq = jnp.round(weight / s_w) * s_w

    out = xq @ wq.T
    if bias is not None:
        out = out + bias
    return out


if __name__ == "__main__":
    key = jax.random.PRNGKey(0)
    kx, kw, kb, kx2, kw2 = jax.random.split(key, 5)

    # Small, non-aligned shapes consistent with the module (nn.Linear(inplane, outplane)).
    batch, inplane, outplane = 12, 200, 136
    abits, wbits = 8, 8          # module defaults when wbits/abits are None
    clip_val = 6.0               # LearnedClippedLinearQuantization init_act_clip_val

    bound = 1.0 / (inplane ** 0.5)   # nn.Linear default init bounds
    weight = jax.random.uniform(kw, (outplane, inplane), jnp.float32, -bound, bound)
    bias = jax.random.uniform(kb, (outplane,), jnp.float32, -bound, bound)
    x = jax.random.normal(kx, (batch, inplane), jnp.float32)

    ref = _reference(x, weight, bias, clip_val, abits, wbits)

    # 1) default bf16 integer-code MXU path (codes <= 255 are exact in bf16).
    out_bf16 = quantized_linear(x, weight, bias, clip_val, abits=abits, wbits=wbits)
    out_bf16 = jax.block_until_ready(out_bf16)
    assert out_bf16.shape == (batch, outplane)
    assert jnp.allclose(out_bf16, ref, atol=2e-3, rtol=2e-3), "bf16 code path mismatch"

    # 2) f32 MXU operands (debug / v5e-conservative path).
    out_f32 = quantized_linear(x, weight, bias, clip_val, abits=abits, wbits=wbits,
                               mxu_dtype=jnp.float32)
    out_f32 = jax.block_until_ready(out_f32)
    assert jnp.allclose(out_f32, ref, atol=2e-3, rtol=2e-3), "f32 path mismatch"

    # 3) cached prepared weight, no bias, multiple K blocks (tk override) and 2 N blocks.
    inplane2, outplane2 = 320, 264
    weight2 = jax.random.uniform(kw2, (outplane2, inplane2), jnp.float32, -bound, bound)
    x2 = jax.random.normal(kx2, (batch, inplane2), jnp.float32)
    prepared = prepare_weight(weight2, wbits=wbits, tk=128)
    ref2 = _reference(x2, weight2, None, clip_val, abits, wbits)
    out2 = quantized_linear(x2, None, None, clip_val, abits=abits, wbits=wbits,
                            prepared_weight=prepared)
    out2 = jax.block_until_ready(out2)
    assert out2.shape == (batch, outplane2)
    assert jnp.allclose(out2, ref2, atol=2e-3, rtol=2e-3), "prepared/no-bias path mismatch"

    print("KERNEL_OK")
</pallas_src>

<mosaic_0001>
module attributes {stable_mosaic.version = 11 : i64} {
  func.func @_weight_code_kernel(%arg0: i32, %arg1: i32, %arg2: memref<128x256xf32, #tpu.memory_space<vmem>>, %arg3: memref<128x1xf32, #tpu.memory_space<vmem>>, %arg4: memref<128x256xbf16, #tpu.memory_space<vmem>>) attributes {dimension_semantics = [#tpu.dimension_semantics<parallel>, #tpu.dimension_semantics<parallel>], iteration_bounds = array<i64: 2, 1>, scalar_prefetch = 0 : i64, scratch_operands = 0 : i64, tpu.core_type = #tpu.core_type<tc>, window_params = [{transform_indices = @transform_0, window_bounds = array<i64: 128, 256>}, {transform_indices = @transform_1, window_bounds = array<i64: 128, 1>}, {transform_indices = @transform_2, window_bounds = array<i64: 128, 256>}]} {
    %c0 = arith.constant 0 : index
    %c0_0 = arith.constant 0 : index
    %0 = vector.load %arg2[%c0, %c0_0] : memref<128x256xf32, #tpu.memory_space<vmem>>, vector<128x256xf32>
    %c0_1 = arith.constant 0 : index
    %c0_2 = arith.constant 0 : index
    %1 = vector.load %arg3[%c0_1, %c0_2] : memref<128x1xf32, #tpu.memory_space<vmem>>, vector<128x1xf32>
    %2 = vector.broadcast %1 : vector<128x1xf32> to vector<128x256xf32>
    %3 = arith.mulf %0, %2 : vector<128x256xf32>
    %4 = math.roundeven %3 : vector<128x256xf32>
    %5 = arith.truncf %4 : vector<128x256xf32> to vector<128x256xbf16>
    %c0_3 = arith.constant 0 : index
    %c0_4 = arith.constant 0 : index
    %6 = vector.load %arg4[%c0_3, %c0_4] : memref<128x256xbf16, #tpu.memory_space<vmem>>, vector<128x256xbf16>
    tpu.vector_store %arg4[%c0_3, %c0_4], %5 {strides = array<i32>} : memref<128x256xbf16, #tpu.memory_space<vmem>>, vector<128x256xbf16>,
    return
  }
  func.func @transform_0(%arg0: i32, %arg1: i32) -> (i32, i32) {
    %c0_i32 = arith.constant 0 : i32
    return %arg0, %arg1 : i32, i32
  }
  func.func @transform_1(%arg0: i32, %arg1: i32) -> (i32, i32) {
    %c0_i32 = arith.constant 0 : i32
    %c0_i32_0 = arith.constant 0 : i32
    return %arg0, %c0_i32 : i32, i32
  }
  func.func @transform_2(%arg0: i32, %arg1: i32) -> (i32, i32) {
    %c0_i32 = arith.constant 0 : i32
    return %arg0, %arg1 : i32, i32
  }
}

</mosaic_0001>

<bundles_post_ra>
// kernel: tpu_custom_call.1
= control target key start
LH: loop header
LB: loop body
LE: loop exit
PB: predicated region body
PF: predicated region fallthrough
CT: control target
= control target key end

     0   :  { %7 = vsyncpa [#allocation3], 0  ;;  %s1152_s0 = inlined_call_operand.hbm [shape: f32[256,256], index: 0, kind: input, shape index: {}]   ;;  %s1153_s1 = inlined_call_operand.vmem [shape: f32[256,1], index: 1, kind: input, shape index: {}]   ;;  %s1154_s2 = inlined_call_operand.hbm [shape: bf16[256,256], index: 2, kind: output, shape index: {}]  }
   0x1   :  { %9 = vsyncpa [#allocation3 + $0x1], 0 }
   0x2   :  { %10 = vsyncpa [#allocation4], 0 }
   0x3   :  { %12 = vsyncpa [#allocation4 + $0x1], 0  ;;  %s919_s9 = smov 0   ;;  %s921_s10 = smov 0  }
   0x4   :  { %s923_s11 = smov 0   ;;  %s925_s12 = smov 0  }
   0x5   :  { %s927_s13 = smov 0   ;;  %s929_s14 = smov 0  }
   0x6 LB: > { %s627_s15 = sadd.s32 4294967295, %s895_s14   ;;  %s628_s16 = sadd.s32 4294967294, %s895_s14   ;;  %s895_s14 = sphi %s929_s14, %s18_s14   ;;  %s891_s13 = sphi %s927_s13, %s1169_s13   ;;  %s887_s12 = sphi %s925_s12, %s1168_s12   ;;  %s883_s11 = sphi %s923_s11, %s1167_s11   ;;  %s879_s10 = sphi %s921_s10, %s1166_s10   ;;  %s875_s9 = sphi %s919_s9, %s1165_s9  }
   0x7   : > { %s30_s17 = sadd.s32 1, %s891_s13  ;;  %s39_s18 = sadd.s32 1, %s883_s11 }
   0x8   : > { %p32_p0 = scmp.ge.s32.totalorder %s30_s17, 2  ;;  %p46_p1 = scmp.ne.s32.totalorder %s883_s11, %s879_s10 }
   0x9   : > { %p47_p2 = scmp.eq.s32.totalorder %s895_s14, 0  ;;  %p52_p3 = scmp.ne.s32.totalorder %s879_s10, %s875_s9 }
   0xa   : > { %s1171_s17 = smov (%p32_p0, %s30_s17), 0  ;;  %p53_p5 = scmp.eq.s32.totalorder %s627_s15, 0 }
   0xb   : > { %p960_p4 = por %p47_p2, %p46_p1  ;;  %s34_s20 = ssub.s32 %s891_s13, %s1171_s17 }
   0xc   : > { %p104_p6 = scmp.eq.s32.totalorder %s627_s15, 1  ;;  %p37_p7 = scmp.eq.s32.totalorder %s34_s20, 0 }
   0xd   : > { %p966_p8 = por %p53_p5, %p52_p3  ;;  %p110_p10 = scmp.eq.s32.totalorder %s628_s16, 1 }
   0xe   : > { %p970_p9 = por %p104_p6, %p46_p1  ;;  %p726_p13 = scmp.lt.s32.totalorder %s895_s14, 2 }
   0xf   : > { %s975_s23 = scalar_select %p37_p7, %s883_s11, %s39_s18  }
  0x10   : > { %s1158_s22 = scalar_select %p970_p9, 1, 0 }
  0x11   : > { %p977_p11 = por %p110_p10, %p52_p3  ;;  %s130_s25 = sand.u32 1, %s883_s11  }
  0x12   : > { %s631_s26 = sshll.u32 %s130_s25, 8  ;;  %s663_s27 = sshll.u32 %s891_s13, 12 }
  0x13   : > { %s1159_s24 = scalar_select %p977_p11, 1, 0 }
  0x14   : > { %s988_s30 = scalar_lea.hbm %s1152_s0, %s663_s27  ;;  %s134_s3 = scalar_lea.vmem [#allocation2], %s631_s26 }
  0x15   : > { %s144_s4 = sshll.u32 %s134_s3, 4  ;;  %p994_p0 = pnand %p726_p13, %p960_p4  ;;  %s990_s4 = int_to_ptr.vmem [resolvable:$true] %s144_s4 }
  0x16   : > { %s999_s6 = scalar_lea.sflag [#allocation3], %s130_s25  ;;  %s783_s7 = scalar_lea.hbm %s988_s30, 4096 }
  0x17   : > { %p784_p2 = scmp.ne.s32.totalorder %s988_s30, %s783_s7  ;;  %p785_p3 = pneg %p994_p0 }
  0x18   : > { %s788_s16 = scalar_lea.hbm %s1152_s0, 8192  ;;  %p789_p4 = scmp.lt.u32.totalorder %s988_s30, %s1152_s0 }
  0x19   : > { %p786_p5 = pnand %p785_p3, %p784_p2  ;;  %p790_p7 = scmp.lt.u32.totalorder %s788_s16, %s783_s7 }
  0x1a   : > { %p792_p13 = scmp.lt.u32.totalorder %s783_s7, %s988_s30 }
  0x1b   : > { %p787_p6 = pneg %p786_p5  ;;  %p791_p10 = por %p790_p7, %p789_p4 }
  0x1d   : > { %p793_p12 = por %p792_p13, %p791_p10 }
  0x1f   : > { %p794_p1 = pnand %p793_p12, %p787_p6 }
  0x21   : > { %797 = shalt.err (!%p794_p1)
}
  0x22   : > { %s798_s20 = scalar_lea.vmem %s990_s4, 4096  ;;  %s897_s25 = smov [#allocation2]  }
  0x23   : > { %p799_p2 = scmp.ne.s32.totalorder %s990_s4, %s798_s20  ;;  %s803_s26 = sshll.u32 %s897_s25, 4  ;;  %s804_s26 = int_to_ptr.vmem [resolvable:$false] %s803_s26 }
  0x24   : > { %s805_s27 = scalar_lea.vmem %s804_s26, 8192  ;;  %p806_p9 = scmp.lt.s32.totalorder %s990_s4, %s804_s26 }
  0x25   : > { %p801_p5 = pnand %p799_p2, %p785_p3  ;;  %p807_p4 = scmp.lt.s32.totalorder %s805_s27, %s798_s20 }
  0x27   : > { %p802_p11 = pneg %p801_p5  ;;  %p808_p7 = por %p807_p4, %p806_p9 }
  0x29   : > { %p809_p10 = pnand %p808_p7, %p802_p11 }
  0x2b   : > { %812 = shalt.err (!%p809_p10)
}
  0x2c   : > { %s898_s28 = smov 256   ;;  %s899_s29 = smov 16  }
  0x2d   : > { %721 = dma.hbm_to_vmem [thread:$0]  (!%p994_p0), %s988_s30, 4096, %s990_s4, %s999_s6, %s898_s28, %s898_s28, %s899_s29  }
  0x2e   : > { %p161_p12 = scmp.lt.s32.totalorder %s895_s14, 3  ;;  %p1161_p1 = scmp.ge.s32.totalorder %s895_s14, 1 }
  0x30   : > { %p162_p3 = pnand %p1161_p1, %p161_p12 }
  0x31   : > { %s1031_s3 = sand.u32 (!%p162_p3), 1, %s879_s10  }
  0x32   : > { %165 = sbr.rel (%p162_p3) target bundleno = 243 (0xf3), region = 28  ;;  %s636_s7 = sshll.u32 (!%p162_p3), %s1031_s3, 8 }
  0x33   : > { %s168_s8 = scalar_lea.sflag (!%p162_p3), [#allocation3], %s1031_s3  ;;  %s1035_s15 = scalar_lea.vmem (!%p162_p3), [#allocation2], %s636_s7 }
  0x39   : > { %866 = dma.done.wait (%p966_p8), %s168_s8, 4096  }
  0x3a   : > { %868 = vsyncadd (%p966_p8), %s168_s8, 4294963200  ;;  %s638_s30 = sshll.u32 %s887_s12, 4  ;;  %v900_v0 = vmov 0   ;;  %v211_v17 = vld [vmem:[%s1035_s15 + $0x20] sm:$0xff]  ;;  %v212_v18 = vld [vmem:[%s1035_s15 + $0x28] sm:$0xff]  ;;  %s637_s21 = sshll.u32 %s1031_s3, 7 }
  0x3b   : > { %782 = vset.pattern.permute.xlu1 %v900_v0  ;;  %781 = vset.pattern.permute.xlu0 %v900_v0  ;;  %p200_p9 = scmp.lt.s32.totalorder %s638_s30, 31  ;;  %v207_v19 = vld [vmem:[%s1035_s15] sm:$0xff]  ;;  %v208_v20 = vld [vmem:[%s1035_s15 + $0x8] sm:$0xff]  ;;  %v213_v27 = vld [vmem:[%s1035_s15 + $0x30] sm:$0xff]  ;;  %s1057_s18 = scalar_lea.vmem [#allocation5], %s637_s21 }
  0x3c   : > { %v214_v28 = vld [vmem:[%s1035_s15 + $0x38] sm:$0xff]  ;;  %v209_v33 = vld [vmem:[%s1035_s15 + $0x10] sm:$0xff]  ;;  %v215_v45 = vld [vmem:[%s1035_s15 + $0x40] sm:$0xff]  ;;  %s681_s19 = sshll.u32 %s887_s12, 11  ;;  %s528_s20 = sshll.u32 %s1057_s18, 4  ;;  %s1101_s20 = int_to_ptr.vmem [resolvable:$true] %s528_s20 }
  0x3d   : > { %s1173_s30 = smov (!%p200_p9, %s638_s30), 31  ;;  %v210_v34 = vld [vmem:[%s1035_s15 + $0x18] sm:$0xff]  ;;  %v217_v43 = vld [vmem:[%s1035_s15 + $0x50] sm:$0xff]  ;;  %v216_v48 = vld [vmem:[%s1035_s15 + $0x48] sm:$0xff]  ;;  %s1099_s27 = scalar_lea.hbm %s1154_s2, %s681_s19 }
  0x3e   : > { %s639_s4 = sshll.u32 %s1173_s30, 3  ;;  %v218_v44 = vld [vmem:[%s1035_s15 + $0x58] sm:$0xff]  ;;  %v221_v59 = vld [vmem:[%s1035_s15 + $0x70] sm:$0xff]  ;;  %v219_v61 = vld [vmem:[%s1035_s15 + $0x60] sm:$0xff]  ;;  %s512_s12 = scalar_lea.sflag [#allocation4], %s1031_s3 }
  0x3f   : > { %s203_s16 = scalar_lea.vmem %s1153_s1, %s639_s4  ;;  %v222_v60 = vld [vmem:[%s1035_s15 + $0x78] sm:$0xff]  ;;  %s813_s28 = scalar_lea.vmem %s1101_s20, 2048 }
  0x40   : > { %v241_v1 = vld [vmem:[%s203_s16 + $0x10] sm:$0xff]  ;;  %v239_v2 = vld [vmem:[%s203_s16] sm:$0xff]  ;;  %v242_v3 = vld [vmem:[%s203_s16 + $0x18] sm:$0xff]  ;;  %p814_p8 = scmp.ne.s32.totalorder %s1101_s20, %s813_s28  ;;  %p1162_p11 = scmp.ne.s32.totalorder %s1158_s22, 0 }
  0x41   : > { %267 = vperm.xlu1 %782, %v241_v1   ;;  %257 = vperm.xlu0 %781, %v239_v2   ;;  %v240_v4 = vld [vmem:[%s203_s16 + $0x8] sm:$0xff]  ;;  %v243_v6 = vld [vmem:[%s203_s16 + $0x20] sm:$0xff]  ;;  %v246_v7 = vld [vmem:[%s203_s16 + $0x38] sm:$0xff]  ;;  %s901_s29 = smov [#allocation5]  }
  0x42   : > { %v244_v5 = vld [vmem:[%s203_s16 + $0x28] sm:$0xff]  ;;  %v245_v8 = vld [vmem:[%s203_s16 + $0x30] sm:$0xff]  ;;  %v247_v10 = vld [vmem:[%s203_s16 + $0x40] sm:$0xff]  ;;  %p815_p0 = pnand %p814_p8, %p1162_p11  ;;  %s817_s7 = sshll.u32 %s901_s29, 4  ;;  %s818_s7 = int_to_ptr.vmem [resolvable:$false] %s817_s7 }
  0x43   : > { %v248_v9 = vld [vmem:[%s203_s16 + $0x48] sm:$0xff]  ;;  %v250_v11 = vld [vmem:[%s203_s16 + $0x58] sm:$0xff]  ;;  %v249_v12 = vld [vmem:[%s203_s16 + $0x50] sm:$0xff]  ;;  %s819_s8 = scalar_lea.vmem %s818_s7, 4096  ;;  %p820_p13 = scmp.lt.s32.totalorder %s1101_s20, %s818_s7 }
  0x44   : > { %v252_v13 = vld [vmem:[%s203_s16 + $0x68] sm:$0xff]  ;;  %v251_v14 = vld [vmem:[%s203_s16 + $0x60] sm:$0xff]  ;;  %v254_v15 = vld [vmem:[%s203_s16 + $0x78] sm:$0xff]  ;;  %p816_p6 = pneg %p815_p0  ;;  %p821_p2 = scmp.lt.s32.totalorder %s819_s8, %s813_s28 }
  0x45   : > { %272 = vperm.xlu1 %782, %v242_v3   ;;  %262 = vperm.xlu0 %781, %v240_v4   ;;  %v253_v16 = vld [vmem:[%s203_s16 + $0x70] sm:$0xff]  ;;  %v220_v1 = vld [vmem:[%s1035_s15 + $0x68] sm:$0xff] }
  0x46   : > { %p822_p5 = por %p821_p2, %p820_p13 }
  0x48   : > { %p823_p4 = pnand %p822_p5, %p816_p6 }
  0x49   : > { %282 = vperm.xlu1 %782, %v244_v5   ;;  %277 = vperm.xlu0 %781, %v243_v6  }
  0x4d   : > { %292 = vperm.xlu1 %782, %v246_v7   ;;  %287 = vperm.xlu0 %781, %v245_v8  }
  0x51   : > { %302 = vperm.xlu1 %782, %v248_v9   ;;  %297 = vperm.xlu0 %781, %v247_v10  }
  0x55   : > { %312 = vperm.xlu1 %782, %v250_v11   ;;  %307 = vperm.xlu0 %781, %v249_v12   ;;  %v225_v11 = vld [vmem:[%s1035_s15 + $0x90] sm:$0xff]  ;;  %v226_v12 = vld [vmem:[%s1035_s15 + $0x98] sm:$0xff] }
  0x59   : > { %322 = vperm.xlu1 %782, %v252_v13   ;;  %317 = vperm.xlu0 %781, %v251_v14   ;;  %v223_v13 = vld [vmem:[%s1035_s15 + $0x80] sm:$0xff] }
  0x5d   : > { %332 = vperm.xlu1 %782, %v254_v15   ;;  %327 = vperm.xlu0 %781, %v253_v16  }
  0xc0   : > { %v268_v21 = vpop.permute.xlu1 %267  ;;  %v258_v22 = vpop.permute.xlu0 %257 }
  0xc1   : > { %v339_v23 = vmul.f32 %v268_v21, %v211_v17  ;;  %v340_v24 = vmul.f32 %v268_v21, %v212_v18  ;;  %v335_v25 = vmul.f32 %v258_v22, %v207_v19  ;;  %v336_v26 = vmul.f32 %v258_v22, %v208_v20  ;;  %v224_v17 = vld [vmem:[%s1035_s15 + $0x88] sm:$0xff] }
  0xc3   : > { %v686_v29 = vround.rtne.f32 %v339_v23  ;;  %v687_v30 = vround.rtne.f32 %v340_v24  ;;  %v682_v31 = vround.rtne.f32 %v335_v25  ;;  %v683_v32 = vround.rtne.f32 %v336_v26 }
  0xc4   : > { %v273_v35 = vpop.permute.xlu1 %272  ;;  %v263_v36 = vpop.permute.xlu0 %262 }
  0xc5   : > { %v666_v37 = vpack.c.bf16 %v687_v30, %v686_v29  ;;  %v664_v38 = vpack.c.bf16 %v683_v32, %v682_v31  ;;  %v341_v39 = vmul.f32 %v273_v35, %v213_v27  ;;  %v342_v40 = vmul.f32 %v273_v35, %v214_v28  ;;  %v229_v27 = vld [vmem:[%s1035_s15 + $0xb0] sm:$0xff]  ;;  %v230_v28 = vld [vmem:[%s1035_s15 + $0xb8] sm:$0xff]  ;;  %v227_v29 = vld [vmem:[%s1035_s15 + $0xa0] sm:$0xff] }
  0xc6   : > { %v337_v41 = vmul.f32 %v263_v36, %v209_v33  ;;  %v338_v42 = vmul.f32 %v263_v36, %v210_v34  ;;  %v228_v33 = vld [vmem:[%s1035_s15 + $0xa8] sm:$0xff] }
  0xc7   : > { %497 = vst [vmem:[%s1057_s18 + $0x10] sm:$0xff] %v666_v37  ;;  %495 = vst [vmem:[%s1057_s18] sm:$0xff] %v664_v38  ;;  %v688_v46 = vround.rtne.f32 %v341_v39  ;;  %v689_v47 = vround.rtne.f32 %v342_v40 }
  0xc8   : > { %v684_v49 = vround.rtne.f32 %v337_v41  ;;  %v685_v50 = vround.rtne.f32 %v338_v42  ;;  %v283_v51 = vpop.permute.xlu1 %282  ;;  %v278_v52 = vpop.permute.xlu0 %277 }
  0xc9   : > { %v667_v53 = vpack.c.bf16 %v689_v47, %v688_v46  ;;  %v345_v54 = vmul.f32 %v283_v51, %v217_v43  ;;  %v346_v55 = vmul.f32 %v283_v51, %v218_v44  ;;  %v343_v56 = vmul.f32 %v278_v52, %v215_v45  ;;  %v233_v43 = vld [vmem:[%s1035_s15 + $0xd0] sm:$0xff]  ;;  %v234_v44 = vld [vmem:[%s1035_s15 + $0xd8] sm:$0xff]  ;;  %v231_v45 = vld [vmem:[%s1035_s15 + $0xc0] sm:$0xff] }
  0xca   : > { %v665_v57 = vpack.c.bf16 %v685_v50, %v684_v49  ;;  %v344_v58 = vmul.f32 %v278_v52, %v216_v48  ;;  %v232_v49 = vld [vmem:[%s1035_s15 + $0xc8] sm:$0xff] }
  0xcb   : > { %498 = vst [vmem:[%s1057_s18 + $0x18] sm:$0xff] %v667_v53  ;;  %v692_v62 = vround.rtne.f32 %v345_v54  ;;  %v693_v63 = vround.rtne.f32 %v346_v55  ;;  %v690_v0 = vround.rtne.f32 %v343_v56 }
  0xcc   : > { %496 = vst [vmem:[%s1057_s18 + $0x8] sm:$0xff] %v665_v57  ;;  %v691_v2 = vround.rtne.f32 %v344_v58  ;;  %v293_v3 = vpop.permute.xlu1 %292  ;;  %v288_v4 = vpop.permute.xlu0 %287 }
  0xcd   : > { %v669_v5 = vpack.c.bf16 %v693_v63, %v692_v62  ;;  %v349_v6 = vmul.f32 %v293_v3, %v221_v59  ;;  %v350_v7 = vmul.f32 %v293_v3, %v222_v60  ;;  %v347_v8 = vmul.f32 %v288_v4, %v219_v61  ;;  %v237_v59 = vld [vmem:[%s1035_s15 + $0xf0] sm:$0xff]  ;;  %v238_v60 = vld [vmem:[%s1035_s15 + $0xf8] sm:$0xff]  ;;  %v235_v61 = vld [vmem:[%s1035_s15 + $0xe0] sm:$0xff] }
  0xce   : > { %v668_v9 = vpack.c.bf16 %v691_v2, %v690_v0  ;;  %v348_v10 = vmul.f32 %v288_v4, %v220_v1  ;;  %v236_v1 = vld [vmem:[%s1035_s15 + $0xe8] sm:$0xff] }
  0xcf   : > { %500 = vst [vmem:[%s1057_s18 + $0x28] sm:$0xff] %v669_v5  ;;  %v696_v14 = vround.rtne.f32 %v349_v6  ;;  %v697_v15 = vround.rtne.f32 %v350_v7  ;;  %v694_v16 = vround.rtne.f32 %v347_v8 }
  0xd0   : > { %499 = vst [vmem:[%s1057_s18 + $0x20] sm:$0xff] %v668_v9  ;;  %v695_v18 = vround.rtne.f32 %v348_v10  ;;  %v303_v19 = vpop.permute.xlu1 %302  ;;  %v298_v20 = vpop.permute.xlu0 %297 }
  0xd1   : > { %v671_v21 = vpack.c.bf16 %v697_v15, %v696_v14  ;;  %v353_v22 = vmul.f32 %v303_v19, %v225_v11  ;;  %v354_v23 = vmul.f32 %v303_v19, %v226_v12  ;;  %v351_v24 = vmul.f32 %v298_v20, %v223_v13 }
  0xd2   : > { %v670_v25 = vpack.c.bf16 %v695_v18, %v694_v16  ;;  %v352_v26 = vmul.f32 %v298_v20, %v224_v17 }
  0xd3   : > { %502 = vst [vmem:[%s1057_s18 + $0x38] sm:$0xff] %v671_v21  ;;  %v700_v30 = vround.rtne.f32 %v353_v22  ;;  %v701_v31 = vround.rtne.f32 %v354_v23  ;;  %v698_v32 = vround.rtne.f32 %v351_v24 }
  0xd4   : > { %501 = vst [vmem:[%s1057_s18 + $0x30] sm:$0xff] %v670_v25  ;;  %v699_v34 = vround.rtne.f32 %v352_v26  ;;  %v313_v35 = vpop.permute.xlu1 %312  ;;  %v308_v36 = vpop.permute.xlu0 %307 }
  0xd5   : > { %v673_v37 = vpack.c.bf16 %v701_v31, %v700_v30  ;;  %v357_v38 = vmul.f32 %v313_v35, %v229_v27  ;;  %v358_v39 = vmul.f32 %v313_v35, %v230_v28  ;;  %v355_v40 = vmul.f32 %v308_v36, %v227_v29 }
  0xd6   : > { %v672_v41 = vpack.c.bf16 %v699_v34, %v698_v32  ;;  %v356_v42 = vmul.f32 %v308_v36, %v228_v33 }
  0xd7   : > { %504 = vst [vmem:[%s1057_s18 + $0x48] sm:$0xff] %v673_v37  ;;  %v704_v46 = vround.rtne.f32 %v357_v38  ;;  %v705_v47 = vround.rtne.f32 %v358_v39  ;;  %v702_v48 = vround.rtne.f32 %v355_v40 }
  0xd8   : > { %503 = vst [vmem:[%s1057_s18 + $0x40] sm:$0xff] %v672_v41  ;;  %v703_v50 = vround.rtne.f32 %v356_v42  ;;  %v323_v51 = vpop.permute.xlu1 %322  ;;  %v318_v52 = vpop.permute.xlu0 %317 }
  0xd9   : > { %v675_v53 = vpack.c.bf16 %v705_v47, %v704_v46  ;;  %v361_v54 = vmul.f32 %v323_v51, %v233_v43  ;;  %v362_v55 = vmul.f32 %v323_v51, %v234_v44  ;;  %v359_v56 = vmul.f32 %v318_v52, %v231_v45 }
  0xda   : > { %v674_v57 = vpack.c.bf16 %v703_v50, %v702_v48  ;;  %v360_v58 = vmul.f32 %v318_v52, %v232_v49 }
  0xdb   : > { %506 = vst [vmem:[%s1057_s18 + $0x58] sm:$0xff] %v675_v53  ;;  %v708_v62 = vround.rtne.f32 %v361_v54  ;;  %v709_v63 = vround.rtne.f32 %v362_v55  ;;  %v706_v0 = vround.rtne.f32 %v359_v56 }
  0xdc   : > { %505 = vst [vmem:[%s1057_s18 + $0x50] sm:$0xff] %v674_v57  ;;  %v707_v2 = vround.rtne.f32 %v360_v58  ;;  %v333_v3 = vpop.permute.xlu1 %332  ;;  %v328_v4 = vpop.permute.xlu0 %327 }
  0xdd   : > { %v677_v5 = vpack.c.bf16 %v709_v63, %v708_v62  ;;  %v365_v6 = vmul.f32 %v333_v3, %v237_v59  ;;  %v366_v7 = vmul.f32 %v333_v3, %v238_v60  ;;  %v363_v8 = vmul.f32 %v328_v4, %v235_v61 }
  0xde   : > { %v676_v9 = vpack.c.bf16 %v707_v2, %v706_v0  ;;  %v364_v10 = vmul.f32 %v328_v4, %v236_v1 }
  0xdf   : > { %508 = vst [vmem:[%s1057_s18 + $0x68] sm:$0xff] %v677_v5  ;;  %v712_v11 = vround.rtne.f32 %v365_v6  ;;  %v713_v12 = vround.rtne.f32 %v366_v7  ;;  %v710_v13 = vround.rtne.f32 %v363_v8 }
  0xe0   : > { %507 = vst [vmem:[%s1057_s18 + $0x60] sm:$0xff] %v676_v9  ;;  %v711_v14 = vround.rtne.f32 %v364_v10 }
  0xe1   : > { %v679_v15 = vpack.c.bf16 %v713_v12, %v712_v11 }
  0xe2   : > { %v678_v16 = vpack.c.bf16 %v711_v14, %v710_v13 }
  0xe3   : > { %510 = vst [vmem:[%s1057_s18 + $0x78] sm:$0xff] %v679_v15 }
  0xe4   : > { %509 = vst [vmem:[%s1057_s18 + $0x70] sm:$0xff] %v678_v16 }
  0xe5   : > { %826 = shalt.err (!%p823_p4)
}
  0xe6   : > { %s827_s15 = scalar_lea.hbm %s1099_s27, 2048  ;;  %s831_s5 = scalar_lea.hbm %s1154_s2, 4096 }
  0xe7   : > { %p828_p7 = scmp.ne.s32.totalorder %s1099_s27, %s827_s15  ;;  %p832_p1 = scmp.lt.u32.totalorder %s1099_s27, %s1154_s2 }
  0xe8   : > { %p833_p3 = scmp.lt.u32.totalorder %s831_s5, %s827_s15  ;;  %p835_p8 = scmp.lt.u32.totalorder %s827_s15, %s1099_s27 }
  0xe9   : > { %p829_p10 = pnand %p828_p7, %p1162_p11 }
  0xea   : > { %p834_p9 = por %p833_p3, %p832_p1 }
  0xeb   : > { %p830_p12 = pneg %p829_p10 }
  0xec   : > { %p836_p0 = por %p835_p8, %p834_p9 }
  0xee   : > { %p837_p6 = pnand %p836_p0, %p830_p12 }
  0xf0   : > { %840 = shalt.err (!%p837_p6)
}
  0xf1   : > { %s902_s21 = smov 128   ;;  %s903_s18 = smov 8  }
  0xf2   : > { %716 = dma.vmem_to_hbm [thread:$0]  (%p1162_p11), %s1101_s20, 2048, %s1099_s27, %s512_s12, %s902_s21, %s902_s21, %s903_s18  }
  0xf3 PF: > { %s543_s19 = sand.u32 1, %s875_s9   ;;  %p1163_p13 = scmp.ne.s32.totalorder %s1159_s24, 0 }
  0xf4   : > { %p1164_p2 = scmp.ge.s32.totalorder %s895_s14, 2  ;;  %s544_s25 = scalar_lea.sflag [#allocation4], %s543_s19 }
  0xf6   : > { %p723_p5 = pnand %p1164_p2, %p1163_p13 }
  0xf8   : > { %870 = dma.done.wait (!%p723_p5), %s544_s25, 2048  }
  0xf9   : > { %872 = vsyncadd (!%p723_p5), %s544_s25, 4294965248  ;;  %s18_s14 = sadd.s32 1, %s895_s14   ;;  %s1165_s9 = smov %s879_s10 }
  0xfa   : > { %p15_p4 = scmp.ge.s32.totalorder %s18_s14, 4   ;;  %s1166_s10 = smov %s883_s11 }
  0xfb   : > { %s1167_s11 = smov %s975_s23  ;;  %s1168_s12 = smov %s891_s13 }
  0xfc   : > { %s1169_s13 = smov %s1171_s17  ;;  %17 = sbr.rel (!%p15_p4) target bundleno = 6 (0x6), region = 76 }
 0x103   :  { %549 = vsyncpa [#allocation3], 1 }
 0x104   :  { %551 = vsyncpa [#allocation3 + $0x1], 1 }
 0x105   :  { %552 = vsyncpa [#allocation4], 1 }
 0x106   :  { %554 = vsyncpa [#allocation4 + $0x1], 1 }

</bundles_post_ra>
